<compile_context>
chip_gen: v7x
topology: tpu7x:2x2x1
jax: 0.10.0
libtpu: 0.0.40
codegen_flags: <defaults>
</compile_context>

<pallas_src>
import math
import functools

import jax
import jax.numpy as jnp
from jax.experimental import pallas as pl
from jax.experimental.pallas import tpu as pltpu

LN_EPS = 1e-5


def dense_kernel(x_ref, w_ref, b_ref, gamma_ref, beta_ref, *rest, out_dim, pack):
    """Fused y = relu(layernorm(x @ W + b)) on one packed (TB, pack*out_dim) tile.

    Each kernel row holds `pack` independent logical rows side by side along the
    lane axis; LayerNorm statistics are computed per out_dim-lane group.
    For pack > 1 the per-group reductions run on the MXU via a membership-matrix
    matmul (m_ref), keeping the XLU out of the critical path.
    """
    if pack == 1:
        (o_ref,) = rest
        m_ref = None
    else:
        m_ref, o_ref = rest

    # Native-dtype operands straight to the MXU; accumulate in f32.
    y = jnp.dot(x_ref[...], w_ref[...], preferred_element_type=jnp.float32)
    y = y + b_ref[...].astype(jnp.float32)            # (1, pack*out_dim) broadcast

    inv_n = jnp.float32(1.0 / out_dim)
    if pack == 1:
        # Plain LayerNorm over the (lane) feature axis, one-pass statistics.
        mean = jnp.sum(y, axis=-1, keepdims=True) * inv_n
        msq = jnp.sum(y * y, axis=-1, keepdims=True) * inv_n
    else:
        # Grouped LayerNorm via MXU: mean/msq broadcast back to all lanes of the
        # group by the membership matmul itself (M is symmetric, block of ones).
        m = m_ref[...]
        mean = jnp.dot(y, m, preferred_element_type=jnp.float32) * inv_n
        msq = jnp.dot(y * y, m, preferred_element_type=jnp.float32) * inv_n

    var = jnp.maximum(msq - mean * mean, 0.0)
    y_hat = (y - mean) * jax.lax.rsqrt(var + LN_EPS)
    y_ln = y_hat * gamma_ref[...].astype(jnp.float32) + beta_ref[...].astype(jnp.float32)

    # Activation (ReLU); store is unmasked because the last dim is 128-lane dense.
    o_ref[...] = jnp.maximum(y_ln, 0.0).astype(o_ref.dtype)


def _choose_pack(batch, in_dim, out_dim, max_pack=8):
    """Rows packed per kernel row so the output (and ideally input) is 128-lane dense."""
    if out_dim % 128 == 0:
        return 1
    base = 128 // math.gcd(out_dim, 128)               # minimal pack for dense output
    if base > max_pack or (batch % base) != 0:
        return 1                                       # no clean packing; fall back
    pack = base
    cand = base
    while cand <= max_pack:                            # bump so x loads are lane-dense too
        if (batch % cand) == 0 and (in_dim * cand) % 128 == 0:
            pack = cand
            break
        cand += base
    return pack


def _pick_block_rows(n_rows, target):
    """Largest row-tile <= target dividing n_rows, multiple of 8, preferring >=2 grid steps."""
    if n_rows <= target:
        # Prefer splitting into 2 steps so v7x's two TensorCores both get work
        # (also enables the DMA-in/compute/DMA-out pipeline overlap).
        half = n_rows // 2
        if n_rows % 2 == 0 and half % 8 == 0:
            return half
        return n_rows                                   # full dim -> always legal
    t = (min(target, n_rows) // 8) * 8
    while t >= 8:
        if n_rows % t == 0:
            return t                                    # multiple of 8 (f32 sublane tile)
        t -= 8
    return n_rows                                       # fallback: single full block


def dense_forward(x, w, b, gamma, beta, *, block_rows=2048):
    """Pallas wrapper. x: (B, in_dim), w: (in_dim, out_dim), b/gamma/beta: (out_dim,)."""
    B, in_dim = x.shape
    out_dim = w.shape[1]

    pack = _choose_pack(B, in_dim, out_dim)
    Bp = B // pack
    in_p = in_dim * pack
    out_p = out_dim * pack

    # Wrapper-side layout plumbing (constant-foldable under jit when weights are static).
    x_p = x.reshape(Bp, in_p)
    if pack == 1:
        w_blk = w
    else:
        # Single block-diagonal construct: group g maps lanes [g*in_dim, (g+1)*in_dim)
        # -> lanes [g*out_dim, (g+1)*out_dim).
        w_blk = jnp.kron(jnp.eye(pack, dtype=w.dtype), w)
    b_p = jnp.tile(b, pack).reshape(1, out_p)
    g_p = jnp.tile(gamma, pack).reshape(1, out_p)
    be_p = jnp.tile(beta, pack).reshape(1, out_p)

    tb = _pick_block_rows(Bp, block_rows)
    grid = (Bp // tb,)

    in_specs = [
        pl.BlockSpec((tb, in_p), lambda i: (i, 0)),        # x: batch-tiled
        pl.BlockSpec((in_p, out_p), lambda i: (0, 0)),     # W: VMEM-resident
        pl.BlockSpec((1, out_p), lambda i: (0, 0)),        # bias
        pl.BlockSpec((1, out_p), lambda i: (0, 0)),        # LN gamma
        pl.BlockSpec((1, out_p), lambda i: (0, 0)),        # LN beta
    ]
    operands = [x_p, w_blk, b_p, g_p, be_p]

    if pack > 1:
        # Group-membership matrix for the MXU-based grouped-LN reductions.
        gid = jnp.arange(out_p, dtype=jnp.int32) // out_dim
        m = (gid[:, None] == gid[None, :]).astype(jnp.float32)   # (out_p, out_p)
        in_specs.append(pl.BlockSpec((out_p, out_p), lambda i: (0, 0)))
        operands.append(m)

    out_packed = pl.pallas_call(
        functools.partial(dense_kernel, out_dim=out_dim, pack=pack),
        out_shape=jax.ShapeDtypeStruct((Bp, out_p), x.dtype),
        grid_spec=pltpu.PrefetchScalarGridSpec(
            num_scalar_prefetch=0,
            grid=grid,
            in_specs=in_specs,
            out_specs=pl.BlockSpec((tb, out_p), lambda i: (i, 0)),
        ),
        compiler_params=pltpu.CompilerParams(
            dimension_semantics=("parallel",),         # shards batch tiles across TCs on v7x
            vmem_limit_bytes=48 * 1024 * 1024,         # > v5e 16MiB default, < ~56MiB v7x cap
        ),
    )(*operands)

    return out_packed.reshape(B, out_dim)


def reference_forward(x, w, b, gamma, beta):
    """Pure-JAX reference of activation(norm(linear(x)))."""
    y = x.astype(jnp.float32) @ w.astype(jnp.float32) + b
    mean = jnp.mean(y, axis=-1, keepdims=True)
    var = jnp.mean((y - mean) ** 2, axis=-1, keepdims=True)
    y = (y - mean) * jax.lax.rsqrt(var + LN_EPS) * gamma + beta
    return jnp.maximum(y, 0.0).astype(x.dtype)


if __name__ == "__main__":
    in_dim, out_dim, batch = 32, 64, 256

    key = jax.random.PRNGKey(0)
    k_x, k_w = jax.random.split(key)

    # Deterministic xavier_uniform init for the Linear weight (bias = 0).
    bound = math.sqrt(6.0 / (in_dim + out_dim))
    w = jax.random.uniform(k_w, (in_dim, out_dim), jnp.float32, -bound, bound)
    b = jnp.zeros((out_dim,), jnp.float32)
    gamma = jnp.ones((out_dim,), jnp.float32)   # LayerNorm weight
    beta = jnp.zeros((out_dim,), jnp.float32)   # LayerNorm bias

    x = jax.random.normal(k_x, (batch, in_dim), jnp.float32)

    # pack=4 -> packed batch 64 rows of 128-lane x / 256-lane out; tile 32 -> 2 grid steps.
    out = dense_forward(x, w, b, gamma, beta)
    out = jax.block_until_ready(out)

    ref = reference_forward(x, w, b, gamma, beta)
    assert out.shape == (batch, out_dim)
    assert jnp.allclose(out, ref, atol=1e-4, rtol=1e-4), "mismatch vs reference"

    print("KERNEL_OK")
</pallas_src>

<mosaic_0001>
module attributes {stable_mosaic.version = 11 : i64} {
  func.func @dense_kernel(%arg0: i32, %arg1: memref<32x128xf32, #tpu.memory_space<vmem>>, %arg2: memref<128x256xf32, #tpu.memory_space<vmem>>, %arg3: memref<1x256xf32, #tpu.memory_space<vmem>>, %arg4: memref<1x256xf32, #tpu.memory_space<vmem>>, %arg5: memref<1x256xf32, #tpu.memory_space<vmem>>, %arg6: memref<256x256xf32, #tpu.memory_space<vmem>>, %arg7: memref<32x256xf32, #tpu.memory_space<vmem>>) attributes {dimension_semantics = [#tpu.dimension_semantics<parallel>], iteration_bounds = array<i64: 2>, scalar_prefetch = 0 : i64, scratch_operands = 0 : i64, tpu.core_type = #tpu.core_type<tc>, window_params = [{transform_indices = @transform_0, window_bounds = array<i64: 32, 128>}, {pipeline_mode = #tpu.pipeline_mode<synchronous>, transform_indices = @transform_1, window_bounds = array<i64: 128, 256>}, {pipeline_mode = #tpu.pipeline_mode<synchronous>, transform_indices = @transform_2, window_bounds = array<i64: 1, 256>}, {pipeline_mode = #tpu.pipeline_mode<synchronous>, transform_indices = @transform_3, window_bounds = array<i64: 1, 256>}, {pipeline_mode = #tpu.pipeline_mode<synchronous>, transform_indices = @transform_4, window_bounds = array<i64: 1, 256>}, {pipeline_mode = #tpu.pipeline_mode<synchronous>, transform_indices = @transform_5, window_bounds = array<i64: 256, 256>}, {transform_indices = @transform_6, window_bounds = array<i64: 32, 256>}]} {
    %c0 = arith.constant 0 : index
    %c0_0 = arith.constant 0 : index
    %0 = vector.load %arg1[%c0, %c0_0] : memref<32x128xf32, #tpu.memory_space<vmem>>, vector<32x128xf32>
    %c0_1 = arith.constant 0 : index
    %c0_2 = arith.constant 0 : index
    %1 = vector.load %arg2[%c0_1, %c0_2] : memref<128x256xf32, #tpu.memory_space<vmem>>, vector<128x256xf32>
    %cst = arith.constant dense<0.000000e+00> : vector<32x256xf32>
    %2 = tpu.matmul %0, %1, %cst {dimension_numbers = #tpu.dot_dimension_numbers<[1], [0], [0], [1], [0, 0, 1, 1], [], []>} : vector<32x128xf32>, vector<128x256xf32>, vector<32x256xf32> -> vector<32x256xf32>
    %c0_3 = arith.constant 0 : index
    %c0_4 = arith.constant 0 : index
    %3 = vector.load %arg3[%c0_3, %c0_4] : memref<1x256xf32, #tpu.memory_space<vmem>>, vector<1x256xf32>
    %4 = vector.broadcast %3 : vector<1x256xf32> to vector<32x256xf32>
    %5 = arith.addf %2, %4 : vector<32x256xf32>
    %c0_5 = arith.constant 0 : index
    %c0_6 = arith.constant 0 : index
    %6 = vector.load %arg6[%c0_5, %c0_6] : memref<256x256xf32, #tpu.memory_space<vmem>>, vector<256x256xf32>
    %cst_7 = arith.constant dense<0.000000e+00> : vector<32x256xf32>
    %7 = tpu.matmul %5, %6, %cst_7 {dimension_numbers = #tpu.dot_dimension_numbers<[1], [0], [0], [1], [0, 0, 1, 1], [], []>} : vector<32x256xf32>, vector<256x256xf32>, vector<32x256xf32> -> vector<32x256xf32>
    %cst_8 = arith.constant 1.562500e-02 : f32
    %8 = vector.broadcast %cst_8 : f32 to vector<32x256xf32>
    %9 = arith.mulf %7, %8 : vector<32x256xf32>
    %10 = arith.mulf %5, %5 : vector<32x256xf32>
    %cst_9 = arith.constant dense<0.000000e+00> : vector<32x256xf32>
    %11 = tpu.matmul %10, %6, %cst_9 {dimension_numbers = #tpu.dot_dimension_numbers<[1], [0], [0], [1], [0, 0, 1, 1], [], []>} : vector<32x256xf32>, vector<256x256xf32>, vector<32x256xf32> -> vector<32x256xf32>
    %cst_10 = arith.constant 1.562500e-02 : f32
    %12 = vector.broadcast %cst_10 : f32 to vector<32x256xf32>
    %13 = arith.mulf %11, %12 : vector<32x256xf32>
    %14 = arith.mulf %9, %9 : vector<32x256xf32>
    %15 = arith.subf %13, %14 : vector<32x256xf32>
    %cst_11 = arith.constant 0.000000e+00 : f32
    %16 = vector.broadcast %cst_11 : f32 to vector<32x256xf32>
    %17 = arith.maximumf %15, %16 : vector<32x256xf32>
    %18 = arith.subf %5, %9 : vector<32x256xf32>
    %cst_12 = arith.constant 9.99999974E-6 : f32
    %19 = vector.broadcast %cst_12 : f32 to vector<32x256xf32>
    %20 = arith.addf %17, %19 : vector<32x256xf32>
    %21 = math.rsqrt %20 : vector<32x256xf32>
    %22 = arith.mulf %18, %21 : vector<32x256xf32>
    %c0_13 = arith.constant 0 : index
    %c0_14 = arith.constant 0 : index
    %23 = vector.load %arg4[%c0_13, %c0_14] : memref<1x256xf32, #tpu.memory_space<vmem>>, vector<1x256xf32>
    %24 = vector.broadcast %23 : vector<1x256xf32> to vector<32x256xf32>
    %25 = arith.mulf %22, %24 : vector<32x256xf32>
    %c0_15 = arith.constant 0 : index
    %c0_16 = arith.constant 0 : index
    %26 = vector.load %arg5[%c0_15, %c0_16] : memref<1x256xf32, #tpu.memory_space<vmem>>, vector<1x256xf32>
    %27 = vector.broadcast %26 : vector<1x256xf32> to vector<32x256xf32>
    %28 = arith.addf %25, %27 : vector<32x256xf32>
    %cst_17 = arith.constant 0.000000e+00 : f32
    %29 = vector.broadcast %cst_17 : f32 to vector<32x256xf32>
    %30 = arith.maximumf %28, %29 : vector<32x256xf32>
    %c0_18 = arith.constant 0 : index
    %c0_19 = arith.constant 0 : index
    %31 = vector.load %arg7[%c0_18, %c0_19] : memref<32x256xf32, #tpu.memory_space<vmem>>, vector<32x256xf32>
    tpu.vector_store %arg7[%c0_18, %c0_19], %30 {strides = array<i32>} : memref<32x256xf32, #tpu.memory_space<vmem>>, vector<32x256xf32>,
    return
  }
  func.func @transform_0(%arg0: i32) -> (i32, i32) {
    %c0_i32 = arith.constant 0 : i32
    %c0_i32_0 = arith.constant 0 : i32
    return %arg0, %c0_i32 : i32, i32
  }
  func.func @transform_1(%arg0: i32) -> (i32, i32) {
    %c0_i32 = arith.constant 0 : i32
    %c0_i32_0 = arith.constant 0 : i32
    %c0_i32_1 = arith.constant 0 : i32
    return %c0_i32, %c0_i32_0 : i32, i32
  }
  func.func @transform_2(%arg0: i32) -> (i32, i32) {
    %c0_i32 = arith.constant 0 : i32
    %c0_i32_0 = arith.constant 0 : i32
    %c0_i32_1 = arith.constant 0 : i32
    return %c0_i32, %c0_i32_0 : i32, i32
  }
  func.func @transform_3(%arg0: i32) -> (i32, i32) {
    %c0_i32 = arith.constant 0 : i32
    %c0_i32_0 = arith.constant 0 : i32
    %c0_i32_1 = arith.constant 0 : i32
    return %c0_i32, %c0_i32_0 : i32, i32
  }
  func.func @transform_4(%arg0: i32) -> (i32, i32) {
    %c0_i32 = arith.constant 0 : i32
    %c0_i32_0 = arith.constant 0 : i32
    %c0_i32_1 = arith.constant 0 : i32
    return %c0_i32, %c0_i32_0 : i32, i32
  }
  func.func @transform_5(%arg0: i32) -> (i32, i32) {
    %c0_i32 = arith.constant 0 : i32
    %c0_i32_0 = arith.constant 0 : i32
    %c0_i32_1 = arith.constant 0 : i32
    return %c0_i32, %c0_i32_0 : i32, i32
  }
  func.func @transform_6(%arg0: i32) -> (i32, i32) {
    %c0_i32 = arith.constant 0 : i32
    %c0_i32_0 = arith.constant 0 : i32
    return %arg0, %c0_i32 : i32, i32
  }
}

</mosaic_0001>

<bundles_post_ra>
// kernel: tpu_custom_call.1
= control target key start
LH: loop header
LB: loop body
LE: loop exit
PB: predicated region body
PF: predicated region fallthrough
CT: control target
= control target key end

     0   :  { %11 = vsyncpa [#allocation3], 0  ;;  %s1818_s0 = inlined_call_operand.hbm [shape: f32[64,128], index: 0, kind: input, shape index: {}]   ;;  %s1819_s1 = inlined_call_operand.hbm [shape: f32[128,256], index: 1, kind: input, shape index: {}]   ;;  %s1820_s2 = inlined_call_operand.vmem [shape: f32[1,256], index: 2, kind: input, shape index: {}]   ;;  %s1821_s3 = inlined_call_operand.vmem [shape: f32[1,256], index: 3, kind: input, shape index: {}]   ;;  %s1822_s4 = inlined_call_operand.vmem [shape: f32[1,256], index: 4, kind: input, shape index: {}]   ;;  %s1823_s5 = inlined_call_operand.hbm [shape: f32[256,256], index: 5, kind: input, shape index: {}]   ;;  %s1824_s6 = inlined_call_operand.hbm [shape: f32[64,256], index: 6, kind: output, shape index: {}]  }
   0x1   :  { %13 = vsyncpa [#allocation3 + $0x1], 0 }
   0x2   :  { %14 = vsyncpa [#allocation6], 0 }
   0x3   :  { %15 = vsyncpa [#allocation4], 0 }
   0x4   :  { %17 = vsyncpa [#allocation4 + $0x1], 0  ;;  %s1399_s21 = smov 0   ;;  %s1401_s22 = smov 0  }
   0x5   :  { %s1403_s23 = smov 0   ;;  %s1405_s24 = smov 0  }
   0x6 LB: > { %s1420_s25 = sadd.s32 4294967295, %s1351_s24   ;;  %s923_s26 = sadd.s32 4294967294, %s1351_s24   ;;  %s1351_s24 = sphi %s1405_s24, %s1844_s24   ;;  %s1347_s23 = sphi %s1403_s23, %s1843_s23   ;;  %s1343_s22 = sphi %s1401_s22, %s1842_s22   ;;  %s1339_s21 = sphi %s1399_s21, %s1841_s21  }
   0x7   : > { %p43_p0 = scmp.ne.s32.totalorder %s1343_s22, %s1339_s21  ;;  %p1825_p1 = scmp.eq.s32.totalorder %s1420_s25, 0 }
   0x8   : > { %p178_p3 = scmp.eq.s32.totalorder %s923_s26, 1  ;;  %p924_p5 = scmp.ge.s32.totalorder %s1351_s24, 1 }
   0x9   : > { %p1429_p4 = por %p1825_p1, %p43_p0  ;;  %p185_p7 = scmp.lt.s32.totalorder %s1351_s24, 3 }
   0xa   : > { %p1434_p6 = por %p178_p3, %p43_p0  ;;  %s1353_s30 = smov [#allocation5]  }
   0xb   : > { %s1828_s27 = scalar_select %p1429_p4, 1, 0 }
   0xc   : > { %s1829_s28 = scalar_select %p1434_p6, 1, 0 }
   0xd   : > { %p1439_p8 = pnand %p924_p5, %p185_p7  ;;  %s197_s7 = sshll.u32 %s1353_s30, 4  ;;  %s1443_s7 = int_to_ptr.vmem [resolvable:$true] %s197_s7 }
   0xe   : > { %s1354_s9 = smov [#allocation7]   ;;  %s1195_s13 = scalar_lea.hbm %s1819_s1, 4096 }
   0xf   : > { %p1117_p9 = pneg %p1439_p8  ;;  %s219_s10 = sshll.u32 %s1354_s9, 4  ;;  %s1454_s10 = int_to_ptr.vmem [resolvable:$true] %s219_s10 }
  0x10   : > { %p1196_p12 = scmp.ne.s32.totalorder %s1819_s1, %s1195_s13  ;;  %p1202_p5 = scmp.lt.u32.totalorder %s1195_s13, %s1819_s1 }
  0x11   : > { %p1450_p11 = pnand %p1117_p9, %p1825_p1 }
  0x13   : > { %p1197_p13 = pneg %p1450_p11 }
  0x15   : > { %p1198_p0 = pnand %p1197_p13, %p1196_p12 }
  0x17   : > { %p1199_p3 = pneg %p1198_p0 }
  0x19   : > { %p1204_p7 = pnand %p1202_p5, %p1199_p3 }
  0x1b   : > { %1207 = shalt.err (!%p1204_p7)
}
  0x1c   : > { %s1208_s18 = scalar_lea.vmem %s1443_s7, 4096  ;;  %p1216_p2 = scmp.lt.s32.totalorder %s1443_s7, %s1443_s7 }
  0x1d   : > { %p1209_p9 = scmp.ne.s32.totalorder %s1443_s7, %s1208_s18  ;;  %p1217_p12 = scmp.lt.s32.totalorder %s1208_s18, %s1208_s18 }
  0x1f   : > { %p1211_p10 = pnand %p1209_p9, %p1197_p13  ;;  %p1218_p0 = por %p1217_p12, %p1216_p2 }
  0x21   : > { %p1212_p1 = pneg %p1211_p10 }
  0x23   : > { %p1219_p6 = pnand %p1218_p0, %p1212_p1 }
  0x25   : > { %1222 = shalt.err (!%p1219_p6)
}
  0x26   : > { %s1355_s19 = smov 256   ;;  %s1356_s20 = smov 16  }
  0x27   : > { %1120 = dma.hbm_to_vmem [thread:$0]  (!%p1450_p11), %s1819_s1, 4096, %s1443_s7, [#allocation6], %s1355_s19, %s1355_s19, %s1356_s20  }
  0x28   : > { %s1223_s12 = scalar_lea.hbm %s1823_s5, 8192 }
  0x29   : > { %p1224_p2 = scmp.ne.s32.totalorder %s1823_s5, %s1223_s12  ;;  %p1230_p10 = scmp.lt.u32.totalorder %s1223_s12, %s1823_s5 }
  0x2b   : > { %p1226_p1 = pnand %p1224_p2, %p1197_p13 }
  0x2d   : > { %p1227_p6 = pneg %p1226_p1 }
  0x2f   : > { %p1232_p3 = pnand %p1230_p10, %p1227_p6 }
  0x31   : > { %1235 = shalt.err (!%p1232_p3)
}
  0x32   : > { %s1236_s7 = scalar_lea.vmem %s1454_s10, 8192  ;;  %p1244_p12 = scmp.lt.s32.totalorder %s1454_s10, %s1454_s10 }
  0x33   : > { %p1237_p5 = scmp.ne.s32.totalorder %s1454_s10, %s1236_s7  ;;  %p1245_p0 = scmp.lt.s32.totalorder %s1236_s7, %s1236_s7 }
  0x35   : > { %p1239_p7 = pnand %p1237_p5, %p1197_p13  ;;  %p1246_p2 = por %p1245_p0, %p1244_p12 }
  0x37   : > { %p1240_p9 = pneg %p1239_p7 }
  0x39   : > { %p1247_p1 = pnand %p1246_p2, %p1240_p9 }
  0x3b   : > { %1250 = shalt.err (!%p1247_p1)
}
  0x3c   : > { %1123 = dma.hbm_to_vmem [thread:$0]  (!%p1450_p11), %s1823_s5, 8192, %s1454_s10, [#allocation6], %s1355_s19, %s1355_s19, %s1356_s20  }
  0x3d   : > { %s1509_s26 = sadd.s32 1, %s1351_s24   ;;  %s30_s8 = sadd.s32 1, %s1347_s23 }
  0x3e   : > { %s27_s30 = ssub.s32 %s1351_s24, %s1509_s26  ;;  %p37_p13 = scmp.ne.s32.totalorder %s1347_s23, %s1343_s22 }
  0x3f   : > { %p28_p6 = scmp.eq.s32.totalorder %s27_s30, 0  ;;  %p38_p10 = scmp.eq.s32.totalorder %s1351_s24, 0 }
  0x40   : > { %p1832_p3 = scmp.eq.s32.totalorder %s1420_s25, 1  ;;  %p1134_p7 = scmp.lt.s32.totalorder %s1351_s24, 2 }
  0x41   : > { %s1525_s11 = scalar_select %p28_p6, %s1347_s23, %s30_s8  }
  0x42   : > { %p1519_p5 = por %p1832_p3, %p37_p13  ;;  %p39_p9 = por %p38_p10, %p37_p13 }
  0x43   : > { %s233_s12 = sand.u32 1, %s1347_s23   ;;  %s942_s10 = sshll.u32 %s1351_s24, 9 }
  0x44   : > { %s1833_s9 = scalar_select %p1519_p5, 1, 0 }
  0x45   : > { %s928_s13 = sshll.u32 %s233_s12, 5  ;;  %s1532_s14 = scalar_lea.hbm %s1818_s0, %s942_s10 }
  0x46   : > { %s237_s15 = scalar_lea.vmem [#allocation2], %s928_s13  ;;  %p1536_p11 = pnand %p1134_p7, %p39_p9 }
  0x47   : > { %s244_s16 = sshll.u32 %s237_s15, 4  ;;  %s1540_s17 = scalar_lea.sflag [#allocation3], %s233_s12  ;;  %s1534_s16 = int_to_ptr.vmem [resolvable:$true] %s244_s16 }
  0x48   : > { %s1251_s18 = scalar_lea.hbm %s1532_s14, 512  ;;  %p1253_p0 = pneg %p1536_p11 }
  0x49   : > { %p1252_p12 = scmp.ne.s32.totalorder %s1532_s14, %s1251_s18  ;;  %s1256_s13 = scalar_lea.hbm %s1818_s0, 1024 }
  0x4a   : > { %p1257_p13 = scmp.lt.u32.totalorder %s1532_s14, %s1818_s0  ;;  %p1258_p6 = scmp.lt.u32.totalorder %s1256_s13, %s1251_s18 }
  0x4b   : > { %p1254_p2 = pnand %p1253_p0, %p1252_p12  ;;  %p1260_p3 = scmp.lt.u32.totalorder %s1251_s18, %s1532_s14 }
  0x4c   : > { %p1259_p10 = por %p1258_p6, %p1257_p13 }
  0x4d   : > { %p1255_p1 = pneg %p1254_p2 }
  0x4e   : > { %p1261_p7 = por %p1260_p3, %p1259_p10 }
  0x50   : > { %p1262_p9 = pnand %p1261_p7, %p1255_p1 }
  0x52   : > { %1265 = shalt.err (!%p1262_p9)
}
  0x53   : > { %s1266_s12 = scalar_lea.vmem %s1534_s16, 512  ;;  %s1357_s20 = smov [#allocation2]  }
  0x54   : > { %p1267_p12 = scmp.ne.s32.totalorder %s1534_s16, %s1266_s12  ;;  %s1271_s15 = sshll.u32 %s1357_s20, 4  ;;  %s1272_s15 = int_to_ptr.vmem [resolvable:$false] %s1271_s15 }
  0x55   : > { %s1273_s8 = scalar_lea.vmem %s1272_s15, 1024  ;;  %p1274_p4 = scmp.lt.s32.totalorder %s1534_s16, %s1272_s15 }
  0x56   : > { %p1269_p2 = pnand %p1267_p12, %p1253_p0  ;;  %p1275_p13 = scmp.lt.s32.totalorder %s1273_s8, %s1266_s12 }
  0x58   : > { %p1270_p5 = pneg %p1269_p2  ;;  %p1276_p6 = por %p1275_p13, %p1274_p4 }
  0x5a   : > { %p1277_p10 = pnand %p1276_p6, %p1270_p5 }
  0x5c   : > { %1280 = shalt.err (!%p1277_p10)
}
  0x5d   : > { %s1358_s18 = smov 128   ;;  %s1359_s30 = smov 8  }
  0x5e   : > { %1127 = dma.hbm_to_vmem [thread:$0]  (!%p1536_p11), %s1532_s14, 512, %s1534_s16, %s1540_s17, %s1358_s18, %s1358_s18, %s1359_s30  }
  0x5f   : > { %256 = sbr.rel (%p1439_p8) target bundleno = 626 (0x272), region = 44  ;;  %s1571_s13 = sand.u32 (!%p1439_p8), 1, %s1343_s22  }
  0x60   : > { %s932_s10 = sshll.u32 (!%p1439_p8), %s1571_s13, 5  ;;  %s259_s19 = scalar_lea.sflag (!%p1439_p8), [#allocation3], %s1571_s13 }
  0x61   : > { %s1575_s12 = scalar_lea.vmem (!%p1439_p8), [#allocation2], %s932_s10  ;;  %p1835_p4 = scmp.ne.s32.totalorder (!%p1439_p8), %s1828_s27, 0 }
  0x66   : > { %1326 = dma.done.wait (%p1835_p4), %s259_s19, 512  }
  0x67   : > { %1328 = vsyncadd (%p1835_p4), %s259_s19, 4294966784  ;;  %p1836_p5 = scmp.eq.s32.totalorder %s1420_s25, 0 }
  0x69   : > { %1330 = dma.done.wait (%p1836_p5), [#allocation6], 12288   ;;  %p1837_p8 = pmov %p1836_p5 }
  0x6a   : > { %v1360_v0 = vmov 0.0   ;;  %v306_v1 = vld [vmem:[#allocation5 + $0x8] sm:$0xff]  ;;  %v308_v2 = vld [vmem:[#allocation5 + $0x18] sm:$0xff]  ;;  %v305_v3 = vld [vmem:[#allocation5] sm:$0xff]  ;;  %s935_s20 = sshll.u32 %s1571_s13, 6  ;;  %s944_s8 = sshll.u32 %s1420_s25, 10 }
  0x6b   : > { %1332 = vsyncadd (%p1837_p8), [#allocation6], 4294955008  ;;  %413 = vmatprep.mubr.f32.mxu0 %v1360_v0  ;;  %v945_v4 = vpack.c.bf16 %v308_v2, %v306_v1  ;;  %v307_v5 = vld [vmem:[#allocation5 + $0x10] sm:$0xff]  ;;  %v310_v6 = vld [vmem:[#allocation5 + $0x28] sm:$0xff]  ;;  %s1749_s15 = scalar_lea.vmem [#allocation8], %s935_s20  ;;  %s1770_s19 = scalar_lea.hbm %s1824_s6, %s944_s8 }
  0x6c   : > { %v312_v7 = vld [vmem:[#allocation5 + $0x38] sm:$0xff]  ;;  %v947_v8 = vpack.c.bf16 %v307_v5, %v305_v3  ;;  %v309_v10 = vld [vmem:[#allocation5 + $0x20] sm:$0xff]  ;;  %v311_v11 = vld [vmem:[#allocation5 + $0x30] sm:$0xff]  ;;  %s831_s18 = sshll.u32 %s1749_s15, 4  ;;  %s817_s25 = scalar_lea.sflag [#allocation4], %s1571_s13  ;;  %s1772_s18 = int_to_ptr.vmem [resolvable:$true] %s831_s18 }
  0x6d   : > { %v949_v9 = vpack.c.bf16 %v312_v7, %v310_v6  ;;  %v314_v12 = vld [vmem:[#allocation5 + $0x48] sm:$0xff]  ;;  %946 = vmatprep.subr.bf16.mxu0 %v945_v4  ;;  %v316_v13 = vld [vmem:[#allocation5 + $0x58] sm:$0xff]  ;;  %v951_v14 = vpack.c.bf16 %v311_v11, %v309_v10  ;;  %v313_v16 = vld [vmem:[#allocation5 + $0x40] sm:$0xff]  ;;  %p1838_p0 = scmp.ne.s32.totalorder %s1833_s9, 0  ;;  %s1361_s27 = smov [#allocation8]  }
  0x6e   : > { %948 = vmatpush1.bf16.msra.mxu0 %v947_v8  ;;  %v953_v15 = vpack.c.bf16 %v316_v13, %v314_v12  ;;  %v315_v17 = vld [vmem:[#allocation5 + $0x50] sm:$0xff]  ;;  %v318_v18 = vld [vmem:[#allocation5 + $0x68] sm:$0xff]  ;;  %v320_v19 = vld [vmem:[#allocation5 + $0x78] sm:$0xff]  ;;  %s1285_s29 = sshll.u32 %s1361_s27, 4  ;;  %s1286_s29 = int_to_ptr.vmem [resolvable:$false] %s1285_s29 }
  0x6f   : > { %950 = vmatprep.subr.bf16.mxu0 %v949_v9  ;;  %v955_v20 = vpack.c.bf16 %v315_v17, %v313_v16  ;;  %v957_v21 = vpack.c.bf16 %v320_v19, %v318_v18  ;;  %v317_v22 = vld [vmem:[#allocation5 + $0x60] sm:$0xff]  ;;  %v319_v23 = vld [vmem:[#allocation5 + $0x70] sm:$0xff]  ;;  %v322_v24 = vld [vmem:[#allocation5 + $0x88] sm:$0xff]  ;;  %s1287_s14 = scalar_lea.vmem %s1286_s29, 2048  ;;  %p1288_p7 = scmp.lt.s32.totalorder %s1772_s18, %s1286_s29 }
  0x70   : > { %v324_v25 = vld [vmem:[#allocation5 + $0x98] sm:$0xff]  ;;  %v321_v26 = vld [vmem:[#allocation5 + $0x80] sm:$0xff]  ;;  %v323_v27 = vld [vmem:[#allocation5 + $0x90] sm:$0xff]  ;;  %v959_v28 = vpack.c.bf16 %v319_v23, %v317_v22 }
  0x71   : > { %v326_v29 = vld [vmem:[#allocation5 + $0xa8] sm:$0xff]  ;;  %v328_v30 = vld [vmem:[#allocation5 + $0xb8] sm:$0xff]  ;;  %v438_v33 = vld [vmem:[#allocation7] sm:$0xff]  ;;  %v961_v34 = vpack.c.bf16 %v324_v25, %v322_v24  ;;  %v963_v45 = vpack.c.bf16 %v323_v27, %v321_v26 }
  0x72   : > { %952 = vmatpush1.bf16.msra.mxu0 %v951_v14  ;;  %v439_v31 = vld [vmem:[#allocation7 + $0x8] sm:$0xff]  ;;  %v441_v32 = vld [vmem:[#allocation7 + $0x18] sm:$0xff]  ;;  %v440_v36 = vld [vmem:[#allocation7 + $0x10] sm:$0xff]  ;;  %v965_v49 = vpack.c.bf16 %v328_v30, %v326_v29 }
  0x73   : > { %954 = vmatprep.subr.bf16.mxu0 %v953_v15  ;;  %v1586_v35 = vpack.c.bf16 %v441_v32, %v439_v31  ;;  %v443_v37 = vld [vmem:[#allocation7 + $0x28] sm:$0xff]  ;;  %v445_v38 = vld [vmem:[#allocation7 + $0x38] sm:$0xff]  ;;  %v1588_v39 = vpack.c.bf16 %v440_v36, %v438_v33  ;;  %v442_v41 = vld [vmem:[#allocation7 + $0x20] sm:$0xff] }
  0x74   : > { %v1590_v40 = vpack.c.bf16 %v445_v38, %v443_v37  ;;  %v444_v42 = vld [vmem:[#allocation7 + $0x30] sm:$0xff]  ;;  %v447_v43 = vld [vmem:[#allocation7 + $0x48] sm:$0xff]  ;;  %v449_v44 = vld [vmem:[#allocation7 + $0x58] sm:$0xff] }
  0x75   : > { %978 = vmatprep.subr.bf16.mxu1 %v1586_v35  ;;  %v325_v46 = vld [vmem:[#allocation5 + $0xa0] sm:$0xff]  ;;  %v327_v47 = vld [vmem:[#allocation5 + $0xb0] sm:$0xff]  ;;  %v1594_v48 = vpack.c.bf16 %v444_v42, %v442_v41  ;;  %v330_v50 = vld [vmem:[#allocation5 + $0xc8] sm:$0xff]  ;;  %v1597_v51 = vpack.c.bf16 %v449_v44, %v447_v43 }
  0x76   : > { %956 = vmatpush1.bf16.msra.mxu0 %v955_v20  ;;  %980 = vmatpush1.bf16.msra.mxu1 %v1588_v39  ;;  %v446_v52 = vld [vmem:[#allocation7 + $0x40] sm:$0xff]  ;;  %v448_v53 = vld [vmem:[#allocation7 + $0x50] sm:$0xff]  ;;  %v332_v54 = vld [vmem:[#allocation5 + $0xd8] sm:$0xff]  ;;  %v967_v57 = vpack.c.bf16 %v327_v47, %v325_v46 }
  0x77   : > { %958 = vmatprep.subr.bf16.mxu0 %v957_v21  ;;  %982 = vmatprep.subr.bf16.mxu1 %v1590_v40  ;;  %v451_v55 = vld [vmem:[#allocation7 + $0x68] sm:$0xff]  ;;  %v453_v56 = vld [vmem:[#allocation7 + $0x78] sm:$0xff]  ;;  %v329_v58 = vld [vmem:[#allocation5 + $0xc0] sm:$0xff]  ;;  %v1600_v60 = vpack.c.bf16 %v448_v53, %v446_v52  ;;  %v969_v61 = vpack.c.bf16 %v332_v54, %v330_v50 }
  0x78   : > { %v331_v59 = vld [vmem:[#allocation5 + $0xd0] sm:$0xff]  ;;  %v334_v62 = vld [vmem:[#allocation5 + $0xe8] sm:$0xff]  ;;  %v1603_v63 = vpack.c.bf16 %v453_v56, %v451_v55  ;;  %v450_v1 = vld [vmem:[#allocation7 + $0x60] sm:$0xff] }
  0x79   : > { %v452_v2 = vld [vmem:[#allocation7 + $0x70] sm:$0xff]  ;;  %v336_v3 = vld [vmem:[#allocation5 + $0xf8] sm:$0xff]  ;;  %v455_v4 = vld [vmem:[#allocation7 + $0x88] sm:$0xff]  ;;  %v971_v6 = vpack.c.bf16 %v331_v59, %v329_v58 }
  0x7a   : > { %960 = vmatpush1.bf16.msra.mxu0 %v959_v28  ;;  %984 = vmatpush1.bf16.msra.mxu1 %v1594_v48  ;;  %v457_v5 = vld [vmem:[#allocation7 + $0x98] sm:$0xff]  ;;  %v333_v7 = vld [vmem:[#allocation5 + $0xe0] sm:$0xff]  ;;  %v1606_v8 = vpack.c.bf16 %v452_v2, %v450_v1  ;;  %v973_v9 = vpack.c.bf16 %v336_v3, %v334_v62  ;;  %v335_v10 = vld [vmem:[#allocation5 + $0xf0] sm:$0xff] }
  0x7b   : > { %962 = vmatprep.subr.bf16.mxu0 %v961_v34  ;;  %986 = vmatprep.subr.bf16.mxu1 %v1597_v51  ;;  %v1609_v11 = vpack.c.bf16 %v457_v5, %v455_v4  ;;  %v454_v12 = vld [vmem:[#allocation7 + $0x80] sm:$0xff]  ;;  %v456_v13 = vld [vmem:[#allocation7 + $0x90] sm:$0xff]  ;;  %v459_v14 = vld [vmem:[#allocation7 + $0xa8] sm:$0xff]  ;;  %v975_v16 = vpack.c.bf16 %v335_v10, %v333_v7 }
  0x7c   : > { %v461_v15 = vld [vmem:[#allocation7 + $0xb8] sm:$0xff]  ;;  %v1612_v17 = vpack.c.bf16 %v456_v13, %v454_v12  ;;  %v458_v19 = vld [vmem:[#allocation7 + $0xa0] sm:$0xff]  ;;  %v460_v20 = vld [vmem:[#allocation7 + $0xb0] sm:$0xff] }
  0x7d   : > { %v1615_v18 = vpack.c.bf16 %v461_v15, %v459_v14  ;;  %v463_v21 = vld [vmem:[#allocation7 + $0xc8] sm:$0xff]  ;;  %v465_v22 = vld [vmem:[#allocation7 + $0xd8] sm:$0xff]  ;;  %v301_v23 = vld [vmem:[%s1575_s12] sm:$0xff]  ;;  %v1621_v24 = vpack.c.bf16 %v460_v20, %v458_v19 }
  0x7e   : > { %964 = vmatpush1.bf16.msra.mxu0 %v963_v45  ;;  %988 = vmatpush1.bf16.msra.mxu1 %v1600_v60  ;;  %v1623_v25 = vpack.c.bf16 %v465_v22, %v463_v21  ;;  %v462_v26 = vld [vmem:[#allocation7 + $0xc0] sm:$0xff]  ;;  %v464_v27 = vld [vmem:[#allocation7 + $0xd0] sm:$0xff]  ;;  %v467_v28 = vld [vmem:[#allocation7 + $0xe8] sm:$0xff]  ;;  %v339_v22 = vlaneseq }
  0x7f   : > { %966 = vmatprep.subr.bf16.mxu0 %v965_v49  ;;  %990 = vmatprep.subr.bf16.mxu1 %v1603_v63  ;;  %v469_v29 = vld [vmem:[#allocation7 + $0xf8] sm:$0xff]  ;;  %v302_v30 = vld [vmem:[%s1575_s12 + $0x8] sm:$0xff]  ;;  %v1630_v31 = vpack.c.bf16 %v464_v27, %v462_v26  ;;  %v466_v33 = vld [vmem:[#allocation7 + $0xe0] sm:$0xff] }
  0x80   : > { %v1005_v32 = vpack.c.bf16 %v469_v29, %v467_v28  ;;  %v468_v34 = vld [vmem:[#allocation7 + $0xf0] sm:$0xff]  ;;  %v473_v36 = vld [vmem:[#allocation7 + $0x118] sm:$0xff]  ;;  %v475_v42 = vld [vmem:[#allocation7 + $0x128] sm:$0xff] }
  0x81   : > { %v303_v37 = vld [vmem:[%s1575_s12 + $0x10] sm:$0xff]  ;;  %v1007_v38 = vpack.c.bf16 %v468_v34, %v466_v33  ;;  %v477_v43 = vld [vmem:[#allocation7 + $0x138] sm:$0xff]  ;;  %v474_v47 = vld [vmem:[#allocation7 + $0x120] sm:$0xff] }
  0x82   : > { %968 = vmatpush1.bf16.msra.mxu0 %v967_v57  ;;  %992 = vmatpush1.bf16.msra.mxu1 %v1606_v8  ;;  %v472_v41 = vld [vmem:[#allocation7 + $0x110] sm:$0xff]  ;;  %v304_v44 = vld [vmem:[%s1575_s12 + $0x18] sm:$0xff]  ;;  %v1013_v46 = vpack.c.bf16 %v477_v43, %v475_v42  ;;  %v479_v49 = vld [vmem:[#allocation7 + $0x148] sm:$0xff]  ;;  %s1281_s12 = scalar_lea.vmem %s1772_s18, 1024 }
  0x83   : > { %970 = vmatprep.subr.bf16.mxu0 %v969_v61  ;;  %994 = vmatprep.subr.bf16.mxu1 %v1609_v11  ;;  %v481_v50 = vld [vmem:[#allocation7 + $0x158] sm:$0xff]  ;;  %v478_v52 = vld [vmem:[#allocation7 + $0x140] sm:$0xff]  ;;  %v480_v53 = vld [vmem:[#allocation7 + $0x150] sm:$0xff]  ;;  %p1282_p11 = scmp.ne.s32.totalorder %s1772_s18, %s1281_s12  ;;  %p1289_p9 = scmp.lt.s32.totalorder %s1287_s14, %s1281_s12 }
  0x84   : > { %v483_v54 = vld [vmem:[#allocation7 + $0x168] sm:$0xff]  ;;  %v485_v55 = vld [vmem:[#allocation7 + $0x178] sm:$0xff]  ;;  %v1019_v56 = vpack.c.bf16 %v480_v53, %v478_v52  ;;  %v482_v58 = vld [vmem:[#allocation7 + $0x160] sm:$0xff] }
  0x85   : > { %v1021_v57 = vpack.c.bf16 %v485_v55, %v483_v54  ;;  %v484_v59 = vld [vmem:[#allocation7 + $0x170] sm:$0xff]  ;;  %v489_v61 = vld [vmem:[#allocation7 + $0x198] sm:$0xff]  ;;  %v486_v1 = vld [vmem:[#allocation7 + $0x180] sm:$0xff]  ;;  %p1283_p1 = pnand %p1282_p11, %p1838_p0  ;;  %p1290_p12 = por %p1289_p9, %p1288_p7 }
  0x86   : > { %972 = vmatpush1.bf16.msra.mxu0 %v971_v6  ;;  %996 = vmatpush1.bf16.msra.mxu1 %v1612_v17  ;;  %v1023_v62 = vpack.c.bf16 %v484_v59, %v482_v58  ;;  %v488_v2 = vld [vmem:[#allocation7 + $0x190] sm:$0xff]  ;;  %v491_v3 = vld [vmem:[#allocation7 + $0x1a8] sm:$0xff]  ;;  %v493_v4 = vld [vmem:[#allocation7 + $0x1b8] sm:$0xff] }
  0x87   : > { %974 = vmatprep.subr.bf16.mxu0 %v973_v9  ;;  %998 = vmatprep.subr.bf16.mxu1 %v1615_v18  ;;  %v1027_v5 = vpack.c.bf16 %v488_v2, %v486_v1  ;;  %v1029_v6 = vpack.c.bf16 %v493_v4, %v491_v3  ;;  %v490_v7 = vld [vmem:[#allocation7 + $0x1a0] sm:$0xff]  ;;  %v495_v9 = vld [vmem:[#allocation7 + $0x1c8] sm:$0xff]  ;;  %v497_v10 = vld [vmem:[#allocation7 + $0x1d8] sm:$0xff]  ;;  %p1284_p3 = pneg %p1283_p1 }
  0x88   : > { %v1033_v12 = vpack.c.bf16 %v497_v10, %v495_v9  ;;  %v494_v13 = vld [vmem:[#allocation7 + $0x1c0] sm:$0xff]  ;;  %v496_v14 = vld [vmem:[#allocation7 + $0x1d0] sm:$0xff] }
  0x89   : > { %v1035_v15 = vpack.c.bf16 %v496_v14, %v494_v13  ;;  %v498_v19 = vld [vmem:[#allocation7 + $0x1e0] sm:$0xff]  ;;  %v500_v20 = vld [vmem:[#allocation7 + $0x1f0] sm:$0xff]  ;;  %p1291_p2 = pnand %p1290_p12, %p1284_p3 }
  0x8a   : > { %976 = vmatpush1.bf16.msra.mxu0 %v975_v16  ;;  %1000 = vmatpush1.bf16.msra.mxu1 %v1621_v24  ;;  %v499_v16 = vld [vmem:[#allocation7 + $0x1e8] sm:$0xff]  ;;  %v1039_v21 = vpack.c.bf16 %v500_v20, %v498_v19 }
  0x8b   : > { %1042 = vmatprep.subr.bf16.mxu0 %v1586_v35  ;;  %1002 = vmatprep.subr.bf16.mxu1 %v1623_v25  ;;  %v471_v35 = vld [vmem:[#allocation7 + $0x108] sm:$0xff] }
  0x8d   : > { %414 = vmatmul.mubr.f32.vlgmr.msra.gmra.mrb[0].mxu0 %v301_v23  ;;  %v340_v23 = vshrl.u32 %v339_v22, 7 }
  0x8e   : > { %419 = vmatprep.mubr.f32.mxu0 %v1360_v0  ;;  %1044 = vmatpush1.bf16.msra.mxu0 %v1588_v39  ;;  %v1009_v39 = vpack.c.bf16 %v473_v36, %v471_v35 }
  0x8f   : > { %1046 = vmatprep.subr.bf16.mxu0 %v1590_v40  ;;  %1004 = vmatpush1.bf16.msra.mxu1 %v1630_v31  ;;  %v470_v40 = vld [vmem:[#allocation7 + $0x100] sm:$0xff]  ;;  %v1654_v26 = vsub.s32 1, %v340_v23 }
  0x90   : > { %1006 = vmatprep.subr.bf16.mxu1 %v1005_v32  ;;  %v1011_v45 = vpack.c.bf16 %v472_v41, %v470_v40 }
  0x91   : > { %420 = vmatmul.mubr.f32.gmra.mrb[2].mxu0 %v302_v30 }
  0x92   : > { %425 = vmatprep.mubr.f32.mxu0 %v1360_v0  ;;  %1048 = vmatpush1.bf16.msra.mxu0 %v1594_v48  ;;  %v476_v48 = vld [vmem:[#allocation7 + $0x130] sm:$0xff] }
  0x93   : > { %1050 = vmatprep.subr.bf16.mxu0 %v1597_v51  ;;  %1008 = vmatpush1.bf16.msra.mxu1 %v1007_v38  ;;  %v1017_v51 = vpack.c.bf16 %v481_v50, %v479_v49 }
  0x94   : > { %1010 = vmatprep.subr.bf16.mxu1 %v1009_v39 }
  0x95   : > { %426 = vmatmul.mubr.f32.gmra.mrb[4].mxu0 %v303_v37 }
  0x96   : > { %431 = vmatprep.mubr.f32.mxu0 %v1360_v0  ;;  %1052 = vmatpush1.bf16.msra.mxu0 %v1600_v60  ;;  %v1015_v0 = vpack.c.bf16 %v476_v48, %v474_v47  ;;  %v487_v60 = vld [vmem:[#allocation7 + $0x188] sm:$0xff] }
  0x97   : > { %1054 = vmatprep.subr.bf16.mxu0 %v1603_v63  ;;  %1012 = vmatpush1.bf16.msra.mxu1 %v1011_v45  ;;  %v1025_v63 = vpack.c.bf16 %v489_v61, %v487_v60 }
  0x98   : > { %1014 = vmatprep.subr.bf16.mxu1 %v1013_v46 }
  0x99   : > { %432 = vmatmul.mubr.f32.gmra.mrb[6].mxu0 %v304_v44 }
  0x9a   : > { %1056 = vmatpush1.bf16.msra.mxu0 %v1606_v8  ;;  %v492_v8 = vld [vmem:[#allocation7 + $0x1b0] sm:$0xff] }
  0x9b   : > { %1058 = vmatprep.subr.bf16.mxu0 %v1609_v11  ;;  %1016 = vmatpush1.bf16.msra.mxu1 %v1015_v0  ;;  %v1031_v11 = vpack.c.bf16 %v492_v8, %v490_v7 }
  0x9c   : > { %1018 = vmatprep.subr.bf16.mxu1 %v1017_v51 }
  0x9e   : > { %1060 = vmatpush1.bf16.msra.mxu0 %v1612_v17  ;;  %v501_v17 = vld [vmem:[#allocation7 + $0x1f8] sm:$0xff] }
  0x9f   : > { %1062 = vmatprep.subr.bf16.mxu0 %v1615_v18  ;;  %1020 = vmatpush1.bf16.msra.mxu1 %v1019_v56  ;;  %v1037_v18 = vpack.c.bf16 %v501_v17, %v499_v16 }
  0xa0   : > { %1022 = vmatprep.subr.bf16.mxu1 %v1021_v57 }
  0xa2   : > { %1064 = vmatpush1.bf16.msra.mxu0 %v1621_v24  ;;  %v1649_v24 = vsub.s32 0, %v340_v23 }
  0xa3   : > { %1066 = vmatprep.subr.bf16.mxu0 %v1623_v25  ;;  %1024 = vmatpush1.bf16.msra.mxu1 %v1023_v62  ;;  %v337_v25 = vld [vmem:[%s1820_s2] sm:$0x3] }
  0xa4   : > { %1026 = vmatprep.subr.bf16.mxu1 %v1025_v63  ;;  %v342_v27 = vrot.slane %v337_v25, %v1649_v24  ;;  %v346_v28 = vrot.slane %v337_v25, %v1654_v26 }
  0xa6   : > { %1068 = vmatpush1.bf16.msra.mxu0 %v1630_v31 }
  0xa7   : > { %1070 = vmatprep.subr.bf16.mxu0 %v1005_v32  ;;  %1028 = vmatpush1.bf16.msra.mxu1 %v1027_v5 }
  0xa8   : > { %1030 = vmatprep.subr.bf16.mxu1 %v1029_v6 }
  0xaa   : > { %1072 = vmatpush1.bf16.msra.mxu0 %v1007_v38 }
  0xab   : > { %1074 = vmatprep.subr.bf16.mxu0 %v1009_v39  ;;  %1032 = vmatpush1.bf16.msra.mxu1 %v1031_v11 }
  0xac   : > { %1034 = vmatprep.subr.bf16.mxu1 %v1033_v12 }
  0xae   : > { %1076 = vmatpush1.bf16.msra.mxu0 %v1011_v45 }
  0xaf   : > { %1078 = vmatprep.subr.bf16.mxu0 %v1013_v46  ;;  %1036 = vmatpush1.bf16.msra.mxu1 %v1035_v15 }
  0xb0   : > { %1038 = vmatprep.subr.bf16.mxu1 %v1037_v18 }
  0xb2   : > { %1080 = vmatpush1.bf16.msra.mxu0 %v1015_v0 }
  0xb3   : > { %1082 = vmatprep.subr.bf16.mxu0 %v1017_v51  ;;  %1040 = vmatpush1.bf16.msra.mxu1 %v1039_v21 }
  0xb6   : > { %1084 = vmatpush1.bf16.msra.mxu0 %v1019_v56 }
  0xb7   : > { %1086 = vmatprep.subr.bf16.mxu0 %v1021_v57 }
  0xba   : > { %1088 = vmatpush1.bf16.msra.mxu0 %v1023_v62 }
  0xbb   : > { %1090 = vmatprep.subr.bf16.mxu0 %v1025_v63 }
  0xbe   : > { %1092 = vmatpush1.bf16.msra.mxu0 %v1027_v5 }
  0xbf   : > { %1094 = vmatprep.subr.bf16.mxu0 %v1029_v6 }
  0xc2   : > { %1096 = vmatpush1.bf16.msra.mxu0 %v1031_v11 }
  0xc3   : > { %1098 = vmatprep.subr.bf16.mxu0 %v1033_v12 }
  0xc6   : > { %1100 = vmatpush1.bf16.msra.mxu0 %v1035_v15 }
  0xc7   : > { %1102 = vmatprep.subr.bf16.mxu0 %v1037_v18 }
  0xca   : > { %1104 = vmatpush1.bf16.msra.mxu0 %v1039_v21 }
 0x160   : > { %v415_v29 = vpop.f32.mrb[0].mxu0 }
 0x161   : > { %v1658_v30 = vadd.f32 %v415_v29, %v342_v27  ;;  %v417_v31 = vpop.f32.mrb[1].mxu0 }
 0x162   : > { %v1660_v32 = vadd.f32 %v417_v31, %v346_v28 }
 0x163   : > { %v599_v35 = vmul.f32 %v1658_v30, %v1658_v30 }
 0x164   : > { %v421_v33 = vpop.f32.mrb[2].mxu0  ;;  %566 = vmatprep.mubr.f32.mxu1 %v1660_v32  ;;  %v600_v34 = vmul.f32 %v1660_v32, %v1660_v32 }
 0x165   : > { %v1667_v36 = vadd.f32 %v421_v33, %v342_v27  ;;  %v423_v37 = vpop.f32.mrb[3].mxu0  ;;  %567 = vmatmul.mubr.f32.vlgmr.msra.gmra.mrb[0].mxu1 %v1658_v30 }
 0x166   : > { %v1670_v38 = vadd.f32 %v423_v37, %v346_v28  ;;  %671 = vmatprep.mubr.f32.mxu0 %v600_v34 }
 0x167   : > { %672 = vmatmul.mubr.f32.vlgmr.msra.gmra.mrb[8].mxu0 %v599_v35  ;;  %v601_v43 = vmul.f32 %v1667_v36, %v1667_v36 }
 0x168   : > { %v427_v39 = vpop.f32.mrb[4].mxu0  ;;  %572 = vmatprep.mubr.f32.mxu1 %v1670_v38  ;;  %v602_v40 = vmul.f32 %v1670_v38, %v1670_v38 }
 0x169   : > { %v1675_v41 = vadd.f32 %v427_v39, %v342_v27  ;;  %v429_v42 = vpop.f32.mrb[5].mxu0  ;;  %573 = vmatmul.mubr.f32.gmra.mrb[2].mxu1 %v1667_v36 }
 0x16a   : > { %v1680_v44 = vadd.f32 %v429_v42, %v346_v28  ;;  %677 = vmatprep.mubr.f32.mxu0 %v602_v40 }
 0x16b   : > { %678 = vmatmul.mubr.f32.gmra.mrb[10].mxu0 %v601_v43  ;;  %v603_v49 = vmul.f32 %v1675_v41, %v1675_v41 }
 0x16c   : > { %v433_v45 = vpop.f32.mrb[6].mxu0  ;;  %578 = vmatprep.mubr.f32.mxu1 %v1680_v44  ;;  %v604_v46 = vmul.f32 %v1680_v44, %v1680_v44 }
 0x16d   : > { %v1685_v47 = vadd.f32 %v433_v45, %v342_v27  ;;  %v435_v48 = vpop.f32.mrb[7].mxu0  ;;  %579 = vmatmul.mubr.f32.gmra.mrb[4].mxu1 %v1675_v41 }
 0x16e   : > { %v1690_v50 = vadd.f32 %v435_v48, %v346_v28  ;;  %683 = vmatprep.mubr.f32.mxu0 %v604_v46 }
 0x16f   : > { %684 = vmatmul.mubr.f32.gmra.mrb[12].mxu0 %v603_v49  ;;  %v605_v51 = vmul.f32 %v1685_v47, %v1685_v47 }
 0x170   : > { %584 = vmatprep.mubr.f32.mxu1 %v1690_v50  ;;  %v606_v0 = vmul.f32 %v1690_v50, %v1690_v50 }
 0x171   : > { %585 = vmatmul.mubr.f32.gmra.mrb[6].mxu1 %v1685_v47 }
 0x172   : > { %689 = vmatprep.mubr.f32.mxu0 %v606_v0  ;;  %v760_v0 = vld [vmem:[%s1821_s3] sm:$0x3] }
 0x173   : > { %690 = vmatmul.mubr.f32.gmra.mrb[14].mxu0 %v605_v51 }
 0x238   : > { %v568_v52 = vpop.f32.mrb[0].mxu1 }
 0x239   : > { %v1698_v53 = vmul.f32 0.015625, %v568_v52  ;;  %v570_v54 = vpop.f32.mrb[1].mxu1 }
 0x23a   : > { %v1700_v55 = vmul.f32 0.015625, %v570_v54  ;;  %v673_v56 = vpop.f32.mrb[8].mxu0 }
 0x23b   : > { %v704_v57 = vmul.f32 %v1698_v53, %v1698_v53  ;;  %v696_v58 = vmul.f32 0.015625, %v673_v56  ;;  %v675_v59 = vpop.f32.mrb[9].mxu0 }
 0x23c   : > { %v705_v60 = vmul.f32 %v1700_v55, %v1700_v55  ;;  %v697_v61 = vmul.f32 0.015625, %v675_v59  ;;  %v574_v62 = vpop.f32.mrb[2].mxu1 }
 0x23d   : > { %v712_v63 = vsub.f32 %v696_v58, %v704_v57  ;;  %v1706_v1 = vmul.f32 0.015625, %v574_v62  ;;  %v576_v2 = vpop.f32.mrb[3].mxu1  ;;  %v780_v57 = vld [vmem:[%s1822_s4] sm:$0x3]  ;;  %v765_v62 = vrot.slane %v760_v0, %v1649_v24 }
 0x23e   : > { %v713_v3 = vsub.f32 %v697_v61, %v705_v60  ;;  %v1708_v4 = vmul.f32 0.015625, %v576_v2  ;;  %v679_v5 = vpop.f32.mrb[10].mxu0  ;;  %v728_v2 = vsub.f32 %v1658_v30, %v1698_v53 }
 0x23f   : > { %v720_v6 = vmax.f32 %v712_v63, 0.0  ;;  %v706_v7 = vmul.f32 %v1706_v1, %v1706_v1  ;;  %v698_v8 = vmul.f32 0.015625, %v679_v5  ;;  %v681_v9 = vpop.f32.mrb[11].mxu0  ;;  %v769_v63 = vrot.slane %v760_v0, %v1654_v26 }
 0x240   : > { %v721_v10 = vmax.f32 %v713_v3, 0.0  ;;  %v707_v11 = vmul.f32 %v1708_v4, %v1708_v4  ;;  %v699_v12 = vmul.f32 0.015625, %v681_v9  ;;  %v580_v13 = vpop.f32.mrb[4].mxu1  ;;  %v729_v5 = vsub.f32 %v1660_v32, %v1700_v55 }
 0x241   : > { %v736_v14 = vadd.f32 1e-05, %v720_v6  ;;  %v714_v15 = vsub.f32 %v698_v8, %v706_v7  ;;  %v1714_v16 = vmul.f32 0.015625, %v580_v13  ;;  %v582_v17 = vpop.f32.mrb[5].mxu1  ;;  %v785_v9 = vrot.slane %v780_v57, %v1649_v24 }
 0x242   : > { %v737_v18 = vadd.f32 1e-05, %v721_v10  ;;  %v715_v19 = vsub.f32 %v699_v12, %v707_v11  ;;  %v1716_v20 = vmul.f32 0.015625, %v582_v17  ;;  %v685_v21 = vpop.f32.mrb[12].mxu0  ;;  %v789_v11 = vrot.slane %v780_v57, %v1654_v26 }
 0x243   : > { %1179 = vrsqrt.f32 %v736_v14  ;;  %v722_v22 = vmax.f32 %v714_v15, 0.0  ;;  %v708_v23 = vmul.f32 %v1714_v16, %v1714_v16  ;;  %v687_v25 = vpop.f32.mrb[13].mxu0  ;;  %v700_v33 = vmul.f32 0.015625, %v685_v21 }
 0x244   : > { %1181 = vrsqrt.f32 %v737_v18  ;;  %v723_v27 = vmax.f32 %v715_v19, 0.0  ;;  %v709_v28 = vmul.f32 %v1716_v20, %v1716_v20  ;;  %v586_v29 = vpop.f32.mrb[6].mxu1  ;;  %v701_v34 = vmul.f32 0.015625, %v687_v25 }
 0x245   : > { %v738_v31 = vadd.f32 1e-05, %v722_v22  ;;  %v1722_v35 = vmul.f32 0.015625, %v586_v29  ;;  %v588_v37 = vpop.f32.mrb[7].mxu1  ;;  %v716_v43 = vsub.f32 %v700_v33, %v708_v23  ;;  %v730_v30 = vsub.f32 %v1667_v36, %v1706_v1 }
 0x246   : > { %v739_v39 = vadd.f32 1e-05, %v723_v27  ;;  %v1724_v40 = vmul.f32 0.015625, %v588_v37  ;;  %v691_v42 = vpop.f32.mrb[14].mxu0  ;;  %v717_v45 = vsub.f32 %v701_v34, %v709_v28  ;;  %v731_v55 = vsub.f32 %v1670_v38, %v1708_v4 }
 0x247   : > { %1183 = vrsqrt.f32 %v738_v31  ;;  %v710_v46 = vmul.f32 %v1722_v35, %v1722_v35  ;;  %v693_v48 = vpop.f32.mrb[15].mxu0  ;;  %v724_v51 = vmax.f32 %v716_v43, 0.0  ;;  %v702_v54 = vmul.f32 0.015625, %v691_v42 }
 0x248   : > { %1185 = vrsqrt.f32 %v739_v39  ;;  %v711_v49 = vmul.f32 %v1724_v40, %v1724_v40  ;;  %v725_v52 = vmax.f32 %v717_v45, 0.0  ;;  %v703_v56 = vmul.f32 0.015625, %v693_v48 }
 0x249   : > { %v740_v58 = vadd.f32 1e-05, %v724_v51  ;;  %v718_v60 = vsub.f32 %v702_v54, %v710_v46  ;;  %v732_v38 = vsub.f32 %v1675_v41, %v1714_v16  ;;  %v733_v27 = vsub.f32 %v1680_v44, %v1716_v20 }
 0x24a   : > { %v741_v59 = vadd.f32 1e-05, %v725_v52  ;;  %v719_v61 = vsub.f32 %v703_v56, %v711_v49  ;;  %v734_v39 = vsub.f32 %v1685_v47, %v1722_v35  ;;  %v735_v44 = vsub.f32 %v1690_v50, %v1724_v40 }
 0x24b   : > { %1187 = vrsqrt.f32 %v740_v58  ;;  %v726_v6 = vmax.f32 %v718_v60, 0.0 }
 0x24c   : > { %v727_v7 = vmax.f32 %v719_v61, 0.0  ;;  %1189 = vrsqrt.f32 %v741_v59 }
 0x24d   : > { %v1180_v3 = vpop.eup %1179  ;;  %v742_v13 = vadd.f32 1e-05, %v726_v6 }
 0x24e   : > { %v1182_v8 = vpop.eup %1181  ;;  %v752_v10 = vmul.f32 %v1180_v3, %v728_v2  ;;  %v743_v14 = vadd.f32 1e-05, %v727_v7 }
 0x24f   : > { %v753_v12 = vmul.f32 %v1182_v8, %v729_v5  ;;  %1191 = vrsqrt.f32 %v742_v13 }
 0x250   : > { %v772_v15 = vmul.f32 %v765_v62, %v752_v10  ;;  %1193 = vrsqrt.f32 %v743_v14 }
 0x251   : > { %v1184_v53 = vpop.eup %1183  ;;  %v773_v32 = vmul.f32 %v769_v63, %v753_v12 }
 0x252   : > { %v1186_v17 = vpop.eup %1185  ;;  %v792_v24 = vadd.f32 %v785_v9, %v772_v15  ;;  %v754_v18 = vmul.f32 %v1184_v53, %v730_v30 }
 0x253   : > { %v793_v19 = vadd.f32 %v789_v11, %v773_v32  ;;  %v755_v26 = vmul.f32 %v1186_v17, %v731_v55 }
 0x254   : > { %v800_v21 = vmax.f32 %v792_v24, 0.0  ;;  %v774_v22 = vmul.f32 %v765_v62, %v754_v18 }
 0x255   : > { %v801_v23 = vmax.f32 %v793_v19, 0.0  ;;  %v775_v25 = vmul.f32 %v769_v63, %v755_v26  ;;  %v1188_v1 = vpop.eup %1187 }
 0x256   : > { %808 = vst [vmem:[%s1749_s15] sm:$0xff] %v800_v21  ;;  %v794_v36 = vadd.f32 %v785_v9, %v774_v22  ;;  %v1190_v28 = vpop.eup %1189  ;;  %v756_v31 = vmul.f32 %v1188_v1, %v732_v38 }
 0x257   : > { %809 = vst [vmem:[%s1749_s15 + $0x8] sm:$0xff] %v801_v23  ;;  %v795_v4 = vadd.f32 %v789_v11, %v775_v25  ;;  %v757_v34 = vmul.f32 %v1190_v28, %v733_v27 }
 0x258   : > { %v802_v29 = vmax.f32 %v794_v36, 0.0  ;;  %v776_v37 = vmul.f32 %v765_v62, %v756_v31 }
 0x259   : > { %v803_v33 = vmax.f32 %v795_v4, 0.0  ;;  %v1192_v41 = vpop.eup %1191  ;;  %v777_v16 = vmul.f32 %v769_v63, %v757_v34 }
 0x25a   : > { %810 = vst [vmem:[%s1749_s15 + $0x10] sm:$0xff] %v802_v29  ;;  %v1194_v20 = vpop.eup %1193  ;;  %v796_v42 = vadd.f32 %v785_v9, %v776_v37  ;;  %v758_v43 = vmul.f32 %v1192_v41, %v734_v39 }
 0x25b   : > { %811 = vst [vmem:[%s1749_s15 + $0x18] sm:$0xff] %v803_v33  ;;  %v797_v45 = vadd.f32 %v789_v11, %v777_v16  ;;  %v759_v46 = vmul.f32 %v1194_v20, %v735_v44 }
 0x25c   : > { %v804_v48 = vmax.f32 %v796_v42, 0.0  ;;  %v778_v49 = vmul.f32 %v765_v62, %v758_v43 }
 0x25d   : > { %v805_v0 = vmax.f32 %v797_v45, 0.0  ;;  %v779_v47 = vmul.f32 %v769_v63, %v759_v46 }
 0x25e   : > { %812 = vst [vmem:[%s1749_s15 + $0x20] sm:$0xff] %v804_v48  ;;  %v798_v35 = vadd.f32 %v785_v9, %v778_v49 }
 0x25f   : > { %813 = vst [vmem:[%s1749_s15 + $0x28] sm:$0xff] %v805_v0  ;;  %v799_v51 = vadd.f32 %v789_v11, %v779_v47 }
 0x260   : > { %v806_v50 = vmax.f32 %v798_v35, 0.0 }
 0x261   : > { %v807_v40 = vmax.f32 %v799_v51, 0.0 }
 0x262   : > { %814 = vst [vmem:[%s1749_s15 + $0x30] sm:$0xff] %v806_v50 }
 0x263   : > { %815 = vst [vmem:[%s1749_s15 + $0x38] sm:$0xff] %v807_v40 }
 0x264   : > { %1294 = shalt.err (!%p1291_p2)
}
 0x265   : > { %s1295_s16 = scalar_lea.hbm %s1770_s19, 1024  ;;  %s1299_s20 = scalar_lea.hbm %s1824_s6, 2048 }
 0x266   : > { %p1296_p13 = scmp.ne.s32.totalorder %s1770_s19, %s1295_s16  ;;  %p1300_p4 = scmp.lt.u32.totalorder %s1770_s19, %s1824_s6 }
 0x267   : > { %p1301_p5 = scmp.lt.u32.totalorder %s1299_s20, %s1295_s16  ;;  %p1303_p11 = scmp.lt.u32.totalorder %s1295_s16, %s1770_s19 }
 0x268   : > { %p1297_p6 = pnand %p1296_p13, %p1838_p0 }
 0x269   : > { %p1302_p8 = por %p1301_p5, %p1300_p4 }
 0x26a   : > { %p1298_p10 = pneg %p1297_p6 }
 0x26b   : > { %p1304_p1 = por %p1303_p11, %p1302_p8 }
 0x26d   : > { %p1305_p3 = pnand %p1304_p1, %p1298_p10 }
 0x26f   : > { %1308 = shalt.err (!%p1305_p3)
}
 0x270   : > { %s1362_s30 = smov 256   ;;  %s1363_s10 = smov 16  }
 0x271   : > { %1115 = dma.vmem_to_hbm [thread:$0]  (%p1838_p0), %s1772_s18, 1024, %s1770_s19, %s817_s25, %s1362_s30, %s1362_s30, %s1363_s10  }
 0x272 PF: > { %s846_s12 = sand.u32 1, %s1339_s21   ;;  %p1839_p7 = scmp.ne.s32.totalorder %s1829_s28, 0 }
 0x273   : > { %p1840_p9 = scmp.ge.s32.totalorder %s1351_s24, 2  ;;  %s847_s27 = scalar_lea.sflag [#allocation4], %s846_s12 }
 0x275   : > { %p1129_p12 = pnand %p1840_p9, %p1839_p7 }
 0x277   : > { %1334 = dma.done.wait (!%p1129_p12), %s847_s27, 1024  }
 0x278   : > { %1336 = vsyncadd (!%p1129_p12), %s847_s27, 4294966272  ;;  %p20_p2 = scmp.ge.s32.totalorder %s1509_s26, 4   ;;  %s1841_s21 = smov %s1343_s22 }
 0x279   : > { %s1842_s22 = smov %s1347_s23  ;;  %s1843_s23 = smov %s1525_s11 }
 0x27a   : > { %s1844_s24 = smov %s1509_s26  ;;  %22 = sbr.rel (!%p20_p2) target bundleno = 6 (0x6), region = 97 }
 0x281   :  { %852 = vsyncpa [#allocation3], 1 }
 0x282   :  { %854 = vsyncpa [#allocation3 + $0x1], 1 }
 0x283   :  { %855 = vsyncpa [#allocation6], 1 }
 0x284   :  { %856 = vsyncpa [#allocation4], 1 }
 0x285   :  { %858 = vsyncpa [#allocation4 + $0x1], 1 }

</bundles_post_ra>
